<compile_context>
chip_gen: v5e
topology: v5e:2x2
jax: 0.10.0
libtpu: 0.0.40
codegen_flags: <defaults>
</compile_context>

<pallas_src>
from functools import partial

import jax
import jax.numpy as jnp
import numpy as np
from jax.experimental import pallas as pl
from jax.experimental.pallas import tpu as pltpu


def _round_up(x, m):
    return ((x + m - 1) // m) * m


def _pick_tile(padded, candidates):
    for t in candidates:
        if padded % t == 0:
            return t
    return candidates[-1]


# ------------------------------ matmul kernels ------------------------------ #
# y = [res +] alpha * (x @ w), everything pre-padded to (8,128) multiples, f32.

def _mm_kernel(x_ref, w_ref, o_ref, *, alpha):
    d = jnp.dot(x_ref[...], w_ref[...], preferred_element_type=jnp.float32)
    o_ref[...] = d if alpha == 1.0 else alpha * d


def _mm_res_kernel(res_ref, x_ref, w_ref, o_ref, *, alpha):
    d = jnp.dot(x_ref[...], w_ref[...], preferred_element_type=jnp.float32)
    o_ref[...] = res_ref[...] + (d if alpha == 1.0 else alpha * d)


def _mm_acc_kernel(x_ref, w_ref, o_ref, *, alpha):
    # Accumulate directly into the (f32, k-resident) output block: no scratch.
    @pl.when(pl.program_id(2) == 0)
    def _():
        o_ref[...] = jnp.zeros_like(o_ref)

    d = jnp.dot(x_ref[...], w_ref[...], preferred_element_type=jnp.float32)
    o_ref[...] += d if alpha == 1.0 else alpha * d


def _mm_res_acc_kernel(res_ref, x_ref, w_ref, o_ref, *, alpha):
    @pl.when(pl.program_id(2) == 0)
    def _():
        o_ref[...] = res_ref[...]

    d = jnp.dot(x_ref[...], w_ref[...], preferred_element_type=jnp.float32)
    o_ref[...] += d if alpha == 1.0 else alpha * d


def _pallas_matmul_padded(x, w, residual=None, alpha=1.0):
    """y = [residual +] alpha * (x @ w); inputs must already be (8,128)-padded f32."""
    R, K = x.shape
    Kw, N = w.shape
    assert Kw == K
    assert R % 8 == 0 and K % 128 == 0 and N % 128 == 0, "inputs must be pre-padded"

    tm = R if R <= 256 else _pick_tile(R, (256, 128, 64, 32, 16, 8))
    tk = _pick_tile(K, (1024, 512, 384, 256, 128))
    tn = _pick_tile(N, (512, 384, 256, 128))
    ni, nj, nk = R // tm, N // tn, K // tk

    x_spec = pl.BlockSpec((tm, tk), lambda i, j, k: (i, k))
    w_spec = pl.BlockSpec((tk, tn), lambda i, j, k: (k, j))
    o_spec = pl.BlockSpec((tm, tn), lambda i, j, k: (i, j))

    if residual is not None:
        in_specs = [o_spec, x_spec, w_spec]
        args = (residual, x, w)
        kernel = _mm_res_kernel if nk == 1 else _mm_res_acc_kernel
    else:
        in_specs = [x_spec, w_spec]
        args = (x, w)
        kernel = _mm_kernel if nk == 1 else _mm_acc_kernel

    params = dict(dimension_semantics=("parallel", "parallel", "arbitrary"))
    tile_bytes = 4 * (2 * (tm * tk + tk * tn) + 2 * tm * tn
                      + (2 * tm * tn if residual is not None else 0))
    if tile_bytes > (12 << 20):   # only raise the scoped limit when actually needed
        params["vmem_limit_bytes"] = int(min(max(2 * tile_bytes, 32 << 20), 64 << 20))

    return pl.pallas_call(
        partial(kernel, alpha=float(alpha)),
        out_shape=jax.ShapeDtypeStruct((R, N), jnp.float32),
        grid_spec=pltpu.PrefetchScalarGridSpec(
            num_scalar_prefetch=0,
            grid=(ni, nj, nk),          # reduction axis last
            in_specs=in_specs,
            out_specs=o_spec,
        ),
        compiler_params=pltpu.CompilerParams(**params),
    )(*args)


# ------------------------------ fused CG kernel ----------------------------- #

def _cg_fused_kernel(y_ref, var_ref, k_ref, o_ref, *, n_iter, eps):
    """Batched-global CG for (K + diag-like var) x = y, K VMEM-resident."""
    y = y_ref[...]
    var = var_ref[...]
    kmat = k_ref[...]

    x = jnp.zeros_like(y)
    r = y                      # A(0) == 0 exactly, so r = y - A(0) = y
    c = y
    kold = jnp.sum(r * r, keepdims=True)            # (1, 1)
    a = jnp.ones((1, 1), jnp.float32)

    # n_iter is small & static -> fully unrolled (LLO scheduler visibility).
    for _ in range(n_iter):
        gate = a > eps                               # (1, 1) bool
        # A(c) = c @ K + c * var   (K = H Sigma^T H^T, precomputed)
        Ac = jnp.dot(c, kmat, preferred_element_type=jnp.float32) + c * var
        cAc = jnp.sum(c * Ac, keepdims=True)
        a_new = kold / jnp.where(cAc == 0.0, 1.0, cAc)      # guard /0 at convergence
        k_safe = jnp.where(kold == 0.0, 1.0, kold)
        # torch's `if a > eps:` freeze, via scalar-selected coefficients:
        #   gate False -> a_sel = 0, s = 0, b_sel = 1  ==> x, r, c, kold, a unchanged.
        a_sel = jnp.where(gate, a_new, 0.0)
        x = x + a_sel * c
        r = r - a_sel * Ac
        k_new = jnp.sum(r * r, keepdims=True)
        b = k_new / k_safe
        s = jnp.where(gate, 1.0, 0.0)
        b_sel = jnp.where(gate, b, 1.0)
        c = s * r + b_sel * c
        kold = jnp.where(gate, k_new, kold)
        a = jnp.where(gate, a_new, a)

    o_ref[...] = x


def _pallas_cg(yp, varp, Kp, *, n_iter, eps):
    Bp, Mp = yp.shape
    kwargs = {}
    need = 4 * (Mp * Mp + 10 * Bp * Mp)
    if need > (12 << 20):
        kwargs["compiler_params"] = pltpu.CompilerParams(
            vmem_limit_bytes=int(min(max(2 * need, 32 << 20), 64 << 20)))
    return pl.pallas_call(
        partial(_cg_fused_kernel, n_iter=int(n_iter), eps=float(eps)),
        out_shape=jax.ShapeDtypeStruct((Bp, Mp), jnp.float32),
        **kwargs,
    )(yp, varp, Kp)


# ----------------------- Generalised_Tikhonov_cg model ---------------------- #

def prepare_generalised_tikhonov_cg(Hsub, Sigma_prior):
    """One-off setup: pad weights and precompute P = H Sigma^T, K = H Sigma^T H^T."""
    Hsub = jnp.asarray(Hsub, jnp.float32)
    Sigma_prior = jnp.asarray(Sigma_prior, jnp.float32)
    M, N = Hsub.shape
    Mp, Np = _round_up(M, 128), _round_up(N, 128)

    Hp = jnp.pad(Hsub, ((0, Mp - M), (0, Np - N)))
    Sp = jnp.pad(Sigma_prior, ((0, Np - N), (0, Np - N)))
    HT_p = jnp.asarray(Hp.T)                       # (Np, Mp), H^T materialized once
    P_p = _pallas_matmul_padded(Hp, Sp.T)          # (Mp, Np) = H @ Sigma^T
    K_p = _pallas_matmul_padded(P_p, HT_p)         # (Mp, Mp) = H @ Sigma^T @ H^T
    return jax.block_until_ready((HT_p, P_p, K_p))


@partial(jax.jit, static_argnames=("N", "n_iter", "eps"))
def generalised_tikhonov_cg(x, x_0, var_noise, HT_p, P_p, K_p, *,
                            N, n_iter=6, eps=1e-6):
    """Forward of Generalised_Tikhonov_cg: (bc, M), (bc, N), (bc, M) -> (bc, N)."""
    bc, M = x.shape
    Np, Mp = HT_p.shape
    Bp = _round_up(bc, 8)

    # Only the tiny per-call activations are padded inside the jit (exact: zeros).
    xp = jnp.pad(x.astype(jnp.float32), ((0, Bp - bc), (0, Mp - M)))
    x0p = jnp.pad(x_0.astype(jnp.float32), ((0, Bp - bc), (0, Np - x_0.shape[1])))
    varp = jnp.pad(var_noise.astype(jnp.float32), ((0, Bp - bc), (0, Mp - M)))

    # y = x - FO.Forward_op(x_0) = x - x_0 @ H^T   (fused residual matmul)
    yp = _pallas_matmul_padded(x0p, HT_p, residual=xp, alpha=-1.0)
    # CG in measurement space with K resident in VMEM (single fused kernel).
    xcg_p = _pallas_cg(yp, varp, K_p, n_iter=n_iter, eps=eps)
    # out = x_0 + Sigma_prior(FO.adjoint(x_cg)) = x_0 + x_cg @ (H Sigma^T)
    outp = _pallas_matmul_padded(xcg_p, P_p, residual=x0p, alpha=1.0)
    return outp[:bc, :N]


# --------------------------------- reference --------------------------------- #

def _reference_numpy(x, x_0, var, H, S, n_iter, eps):
    x = np.asarray(x, np.float64); x_0 = np.asarray(x_0, np.float64)
    var = np.asarray(var, np.float64)
    H = np.asarray(H, np.float64); S = np.asarray(S, np.float64)

    def fwd(v): return v @ H.T
    def adj(v): return v @ H
    def sig(v): return v @ S.T
    def A(v): return fwd(sig(adj(v))) + v * var

    y = x - fwd(x_0)
    xk = np.zeros_like(y)
    r = y - A(xk)
    c = r.copy()
    kold = np.sum(r * r)
    a = 1.0
    for _ in range(n_iter):
        if a > eps:
            Ac = A(c)
            cAc = np.sum(c * Ac)
            a = kold / cAc
            xk = xk + a * c
            r = r - a * Ac
            k = np.sum(r * r)
            b = k / kold
            c = r + b * c
            kold = k
    return x_0 + sig(adj(xk))


if __name__ == "__main__":
    key = jax.random.PRNGKey(0)
    k1, k2, k3, k4, k5 = jax.random.split(key, 5)

    b, ch = 2, 4
    bc = b * ch                 # 8 flattened batch rows
    img = 16
    N = img * img               # 256 pixels
    M = 96                      # measurements (deliberately not a multiple of 128)
    n_iter, eps = 6, 1e-6

    Hsub = jax.random.normal(k1, (M, N), jnp.float32) / jnp.sqrt(N)
    Rm = jax.random.normal(k2, (N, N), jnp.float32) * 0.1
    Sigma_prior = Rm @ Rm.T / N + jnp.eye(N, dtype=jnp.float32)   # SPD prior covariance
    x = jax.random.normal(k3, (bc, M), jnp.float32)
    x_0 = jax.random.normal(k4, (bc, N), jnp.float32)
    var_noise = jax.random.uniform(k5, (bc, M), jnp.float32, minval=0.5, maxval=1.5)

    # One-off weight preparation (padding, transpose, K = H Sigma^T H^T precompute).
    HT_p, P_p, K_p = prepare_generalised_tikhonov_cg(Hsub, Sigma_prior)

    out = generalised_tikhonov_cg(x, x_0, var_noise, HT_p, P_p, K_p,
                                  N=N, n_iter=n_iter, eps=eps)
    out = jax.block_until_ready(out)
    assert out.shape == (bc, N)

    ref = _reference_numpy(x, x_0, var_noise, Hsub, Sigma_prior, n_iter, eps)
    rel_err = np.max(np.abs(np.asarray(out, np.float64) - ref)) / (
        np.max(np.abs(ref)) + 1e-12)
    # f32 MXU accumulation + K-precompute reassociation, vs f64 reference.
    assert rel_err < 5e-2, f"relative error too large: {rel_err}"

    print("KERNEL_OK")
</pallas_src>

<mosaic_0001>
module attributes {stable_mosaic.version = 11 : i64} {
  func.func @_mm_kernel(%arg0: i32, %arg1: i32, %arg2: i32, %arg3: memref<128x256xf32, #tpu.memory_space<vmem>>, %arg4: memref<256x256xf32, #tpu.memory_space<vmem>>, %arg5: memref<128x256xf32, #tpu.memory_space<vmem>>) attributes {dimension_semantics = [#tpu.dimension_semantics<parallel>, #tpu.dimension_semantics<parallel>, #tpu.dimension_semantics<arbitrary>], iteration_bounds = array<i64: 1, 1, 1>, scalar_prefetch = 0 : i64, scratch_operands = 0 : i64, tpu.core_type = #tpu.core_type<tc>, window_params = [{transform_indices = @transform_0, window_bounds = array<i64: 128, 256>}, {transform_indices = @transform_1, window_bounds = array<i64: 256, 256>}, {transform_indices = @transform_2, window_bounds = array<i64: 128, 256>}]} {
    %c0 = arith.constant 0 : index
    %c0_0 = arith.constant 0 : index
    %0 = vector.load %arg3[%c0, %c0_0] : memref<128x256xf32, #tpu.memory_space<vmem>>, vector<128x256xf32>
    %c0_1 = arith.constant 0 : index
    %c0_2 = arith.constant 0 : index
    %1 = vector.load %arg4[%c0_1, %c0_2] : memref<256x256xf32, #tpu.memory_space<vmem>>, vector<256x256xf32>
    %cst = arith.constant dense<0.000000e+00> : vector<128x256xf32>
    %2 = tpu.matmul %0, %1, %cst {dimension_numbers = #tpu.dot_dimension_numbers<[1], [0], [0], [1], [0, 0, 1, 1], [], []>} : vector<128x256xf32>, vector<256x256xf32>, vector<128x256xf32> -> vector<128x256xf32>
    %c0_3 = arith.constant 0 : index
    %c0_4 = arith.constant 0 : index
    %3 = vector.load %arg5[%c0_3, %c0_4] : memref<128x256xf32, #tpu.memory_space<vmem>>, vector<128x256xf32>
    tpu.vector_store %arg5[%c0_3, %c0_4], %2 {strides = array<i32>} : memref<128x256xf32, #tpu.memory_space<vmem>>, vector<128x256xf32>,
    return
  }
  func.func @transform_0(%arg0: i32, %arg1: i32, %arg2: i32) -> (i32, i32) {
    %c0_i32 = arith.constant 0 : i32
    return %arg0, %arg2 : i32, i32
  }
  func.func @transform_1(%arg0: i32, %arg1: i32, %arg2: i32) -> (i32, i32) {
    %c0_i32 = arith.constant 0 : i32
    return %arg2, %arg1 : i32, i32
  }
  func.func @transform_2(%arg0: i32, %arg1: i32, %arg2: i32) -> (i32, i32) {
    %c0_i32 = arith.constant 0 : i32
    return %arg0, %arg1 : i32, i32
  }
}

</mosaic_0001>

<bundles_post_ra>
// kernel: tpu_custom_call.1
= control target key start
LH: loop header
LB: loop body
LE: loop exit
PB: predicated region body
PF: predicated region fallthrough
CT: control target
= control target key end

     0   :  { %7 = vsyncpa [#allocation3], 0  ;;  %s573_s0 = inlined_call_operand.hbm [shape: f32[128,256], index: 0, kind: input, shape index: {}]   ;;  %s574_s1 = inlined_call_operand.hbm [shape: f32[256,256], index: 1, kind: input, shape index: {}]   ;;  %s575_s2 = inlined_call_operand.hbm [shape: f32[128,256], index: 2, kind: output, shape index: {}]  }
   0x1   :  { %8 = vsyncpa [#allocation6], 0 }
   0x2   :  { %9 = vsyncpa [#allocation4], 0  ;;  %s14_s11 = sshll.u32 %s573_s0, 4  ;;  %s535_s12 = smov [#allocation2]   ;;  %s15_s11 = int_to_ptr.hbm [resolvable:$true] %s14_s11 }
   0x3   :  { %s16_s13 = sshll.u32 %s535_s12, 4  ;;  %s27_s16 = sshll.u32 %s574_s1, 4  ;;  %s17_s13 = int_to_ptr.vmem [resolvable:$true] %s16_s13  ;;  %s28_s16 = int_to_ptr.hbm [resolvable:$true] %s27_s16 }
   0x4   :  { %s536_s17 = smov 256   ;;  %s537_s18 = smov 16  }
   0x5   :  { %22 = dma.hbm_to_vmem [thread:$0]  %s15_s11, 4096, %s17_s13, [#allocation3], %s536_s17, %s536_s17, %s537_s18  }
   0x6   :  { %s538_s19 = smov [#allocation5]  }
   0x7   :  { %s29_s20 = sshll.u32 %s538_s19, 4  ;;  %s30_s20 = int_to_ptr.vmem [resolvable:$true] %s29_s20 }
   0x8   :  { %35 = dma.hbm_to_vmem [thread:$0]  %s28_s16, 8192, %s30_s20, [#allocation6], %s536_s17, %s536_s17, %s537_s18  }
   0x9   :  { %529 = dma.done.wait [#allocation3], 4096  }
   0xa   :  { %530 = vsyncadd [#allocation3], 4294963200 }
   0xb   :  { %531 = dma.done.wait [#allocation6], 8192  }
   0xc   :  { %532 = vsyncadd [#allocation6], 4294959104  ;;  %v107_v0 = vld [vmem:[#allocation5 + $0xf8] sm:$0xff]  ;;  %v105_v2 = vld [vmem:[#allocation5 + $0xe8] sm:$0xff]  ;;  %s539_s0 = smov [#allocation7]   ;;  %s438_s23 = sshll.u32 %s575_s2, 4  ;;  %s439_s23 = int_to_ptr.hbm [resolvable:$true] %s438_s23 }
   0xd   :  { %v139_v1 = vld [vmem:[#allocation5 + $0x1f8] sm:$0xff]  ;;  %270 = vmatpush.msra.mxu2 %v107_v0  ;;  %v137_v3 = vld [vmem:[#allocation5 + $0x1e8] sm:$0xff]  ;;  %v106_v6 = vld [vmem:[#allocation5 + $0xf0] sm:$0xff]  ;;  %s436_s1 = sshll.u32 %s539_s0, 4  ;;  %s437_s1 = int_to_ptr.vmem [resolvable:$true] %s436_s1 }
   0xe   :  { %335 = vmatpush.msra.mxu3 %v139_v1  ;;  %v103_v4 = vld [vmem:[#allocation5 + $0xd8] sm:$0xff]  ;;  %v138_v7 = vld [vmem:[#allocation5 + $0x1f0] sm:$0xff]  ;;  %v104_v8 = vld [vmem:[#allocation5 + $0xe0] sm:$0xff]  ;;  %140 = vmatpush.msra.mxu0 %v106_v6 }
   0xf   :  { %v135_v5 = vld [vmem:[#allocation5 + $0x1d8] sm:$0xff]  ;;  %271 = vmatpush.msra.mxu2 %v105_v2  ;;  %v136_v9 = vld [vmem:[#allocation5 + $0x1e0] sm:$0xff]  ;;  %205 = vmatpush.msra.mxu1 %v138_v7  ;;  %v101_v10 = vld [vmem:[#allocation5 + $0xc8] sm:$0xff] }
  0x10   :  { %336 = vmatpush.msra.mxu3 %v137_v3  ;;  %v133_v11 = vld [vmem:[#allocation5 + $0x1c8] sm:$0xff]  ;;  %v102_v12 = vld [vmem:[#allocation5 + $0xd0] sm:$0xff]  ;;  %141 = vmatpush.msra.mxu0 %v104_v8  ;;  %v99_v14 = vld [vmem:[#allocation5 + $0xb8] sm:$0xff] }
  0x11   :  { %272 = vmatpush.msra.mxu2 %v103_v4  ;;  %v134_v13 = vld [vmem:[#allocation5 + $0x1d0] sm:$0xff]  ;;  %206 = vmatpush.msra.mxu1 %v136_v9  ;;  %v131_v15 = vld [vmem:[#allocation5 + $0x1b8] sm:$0xff]  ;;  %v100_v16 = vld [vmem:[#allocation5 + $0xc0] sm:$0xff] }
  0x12   :  { %337 = vmatpush.msra.mxu3 %v135_v5  ;;  %v132_v17 = vld [vmem:[#allocation5 + $0x1c0] sm:$0xff]  ;;  %142 = vmatpush.msra.mxu0 %v102_v12  ;;  %v97_v18 = vld [vmem:[#allocation5 + $0xa8] sm:$0xff]  ;;  %v98_v20 = vld [vmem:[#allocation5 + $0xb0] sm:$0xff] }
  0x13   :  { %273 = vmatpush.msra.mxu2 %v101_v10  ;;  %207 = vmatpush.msra.mxu1 %v134_v13  ;;  %v129_v19 = vld [vmem:[#allocation5 + $0x1a8] sm:$0xff]  ;;  %v130_v21 = vld [vmem:[#allocation5 + $0x1b0] sm:$0xff]  ;;  %v95_v22 = vld [vmem:[#allocation5 + $0x98] sm:$0xff] }
  0x14   :  { %338 = vmatpush.msra.mxu3 %v133_v11  ;;  %143 = vmatpush.msra.mxu0 %v100_v16  ;;  %v127_v23 = vld [vmem:[#allocation5 + $0x198] sm:$0xff]  ;;  %v96_v24 = vld [vmem:[#allocation5 + $0xa0] sm:$0xff]  ;;  %v93_v26 = vld [vmem:[#allocation5 + $0x88] sm:$0xff] }
  0x15   :  { %274 = vmatpush.msra.mxu2 %v99_v14  ;;  %208 = vmatpush.msra.mxu1 %v132_v17  ;;  %v128_v25 = vld [vmem:[#allocation5 + $0x1a0] sm:$0xff]  ;;  %v125_v27 = vld [vmem:[#allocation5 + $0x188] sm:$0xff]  ;;  %v94_v28 = vld [vmem:[#allocation5 + $0x90] sm:$0xff] }
  0x16   :  { %339 = vmatpush.msra.mxu3 %v131_v15  ;;  %144 = vmatpush.msra.mxu0 %v98_v20  ;;  %v126_v29 = vld [vmem:[#allocation5 + $0x190] sm:$0xff]  ;;  %v91_v30 = vld [vmem:[#allocation5 + $0x78] sm:$0xff]  ;;  %v92_v32 = vld [vmem:[#allocation5 + $0x80] sm:$0xff] }
  0x17   :  { %275 = vmatpush.msra.mxu2 %v97_v18  ;;  %209 = vmatpush.msra.mxu1 %v130_v21  ;;  %v123_v31 = vld [vmem:[#allocation5 + $0x178] sm:$0xff]  ;;  %v124_v33 = vld [vmem:[#allocation5 + $0x180] sm:$0xff]  ;;  %v89_v34 = vld [vmem:[#allocation5 + $0x68] sm:$0xff] }
  0x18   :  { %340 = vmatpush.msra.mxu3 %v129_v19  ;;  %145 = vmatpush.msra.mxu0 %v96_v24  ;;  %v121_v35 = vld [vmem:[#allocation5 + $0x168] sm:$0xff]  ;;  %v90_v36 = vld [vmem:[#allocation5 + $0x70] sm:$0xff]  ;;  %v87_v38 = vld [vmem:[#allocation5 + $0x58] sm:$0xff] }
  0x19   :  { %276 = vmatpush.msra.mxu2 %v95_v22  ;;  %210 = vmatpush.msra.mxu1 %v128_v25  ;;  %v122_v37 = vld [vmem:[#allocation5 + $0x170] sm:$0xff]  ;;  %v119_v39 = vld [vmem:[#allocation5 + $0x158] sm:$0xff]  ;;  %v88_v40 = vld [vmem:[#allocation5 + $0x60] sm:$0xff] }
  0x1a   :  { %341 = vmatpush.msra.mxu3 %v127_v23  ;;  %146 = vmatpush.msra.mxu0 %v94_v28  ;;  %v120_v41 = vld [vmem:[#allocation5 + $0x160] sm:$0xff]  ;;  %v85_v42 = vld [vmem:[#allocation5 + $0x48] sm:$0xff]  ;;  %v86_v44 = vld [vmem:[#allocation5 + $0x50] sm:$0xff] }
  0x1b   :  { %277 = vmatpush.msra.mxu2 %v93_v26  ;;  %211 = vmatpush.msra.mxu1 %v126_v29  ;;  %v117_v43 = vld [vmem:[#allocation5 + $0x148] sm:$0xff]  ;;  %v118_v45 = vld [vmem:[#allocation5 + $0x150] sm:$0xff]  ;;  %v83_v46 = vld [vmem:[#allocation5 + $0x38] sm:$0xff] }
  0x1c   :  { %342 = vmatpush.msra.mxu3 %v125_v27  ;;  %147 = vmatpush.msra.mxu0 %v92_v32  ;;  %v115_v47 = vld [vmem:[#allocation5 + $0x138] sm:$0xff]  ;;  %v84_v48 = vld [vmem:[#allocation5 + $0x40] sm:$0xff]  ;;  %v81_v50 = vld [vmem:[#allocation5 + $0x28] sm:$0xff] }
  0x1d   :  { %278 = vmatpush.msra.mxu2 %v91_v30  ;;  %212 = vmatpush.msra.mxu1 %v124_v33  ;;  %v116_v49 = vld [vmem:[#allocation5 + $0x140] sm:$0xff]  ;;  %v113_v51 = vld [vmem:[#allocation5 + $0x128] sm:$0xff]  ;;  %v82_v52 = vld [vmem:[#allocation5 + $0x30] sm:$0xff] }
  0x1e   :  { %343 = vmatpush.msra.mxu3 %v123_v31  ;;  %148 = vmatpush.msra.mxu0 %v90_v36  ;;  %v114_v53 = vld [vmem:[#allocation5 + $0x130] sm:$0xff]  ;;  %v79_v54 = vld [vmem:[#allocation5 + $0x18] sm:$0xff]  ;;  %v80_v56 = vld [vmem:[#allocation5 + $0x20] sm:$0xff] }
  0x1f   :  { %279 = vmatpush.msra.mxu2 %v89_v34  ;;  %213 = vmatpush.msra.mxu1 %v122_v37  ;;  %v111_v55 = vld [vmem:[#allocation5 + $0x118] sm:$0xff]  ;;  %v112_v57 = vld [vmem:[#allocation5 + $0x120] sm:$0xff]  ;;  %v77_v58 = vld [vmem:[#allocation5 + $0x8] sm:$0xff] }
  0x20   :  { %344 = vmatpush.msra.mxu3 %v121_v35  ;;  %149 = vmatpush.msra.mxu0 %v88_v40  ;;  %v109_v59 = vld [vmem:[#allocation5 + $0x108] sm:$0xff]  ;;  %v44_v60 = vld [vmem:[#allocation2] sm:$0xff]  ;;  %v78_v62 = vld [vmem:[#allocation5 + $0x10] sm:$0xff] }
  0x21   :  { %280 = vmatpush.msra.mxu2 %v87_v38  ;;  %214 = vmatpush.msra.mxu1 %v120_v41  ;;  %v45_v61 = vld [vmem:[#allocation2 + $0x8] sm:$0xff]  ;;  %v110_v63 = vld [vmem:[#allocation5 + $0x110] sm:$0xff]  ;;  %v76_v0 = vld [vmem:[#allocation5] sm:$0xff] }
  0x22   :  { %345 = vmatpush.msra.mxu3 %v119_v39  ;;  %150 = vmatpush.msra.mxu0 %v86_v44  ;;  %v108_v1 = vld [vmem:[#allocation5 + $0x100] sm:$0xff]  ;;  %v46_v2 = vld [vmem:[#allocation2 + $0x10] sm:$0xff]  ;;  %v47_v3 = vld [vmem:[#allocation2 + $0x18] sm:$0xff] }
  0x23   :  { %281 = vmatpush.msra.mxu2 %v85_v42  ;;  %215 = vmatpush.msra.mxu1 %v118_v45  ;;  %v48_v4 = vld [vmem:[#allocation2 + $0x20] sm:$0xff]  ;;  %v49_v5 = vld [vmem:[#allocation2 + $0x28] sm:$0xff]  ;;  %v50_v6 = vld [vmem:[#allocation2 + $0x30] sm:$0xff] }
  0x24   :  { %346 = vmatpush.msra.mxu3 %v117_v43  ;;  %151 = vmatpush.msra.mxu0 %v84_v48  ;;  %v51_v7 = vld [vmem:[#allocation2 + $0x38] sm:$0xff]  ;;  %v52_v8 = vld [vmem:[#allocation2 + $0x40] sm:$0xff]  ;;  %v53_v9 = vld [vmem:[#allocation2 + $0x48] sm:$0xff] }
  0x25   :  { %282 = vmatpush.msra.mxu2 %v83_v46  ;;  %216 = vmatpush.msra.mxu1 %v116_v49  ;;  %v54_v10 = vld [vmem:[#allocation2 + $0x50] sm:$0xff]  ;;  %v55_v11 = vld [vmem:[#allocation2 + $0x58] sm:$0xff]  ;;  %v56_v12 = vld [vmem:[#allocation2 + $0x60] sm:$0xff] }
  0x26   :  { %347 = vmatpush.msra.mxu3 %v115_v47  ;;  %152 = vmatpush.msra.mxu0 %v82_v52  ;;  %v57_v13 = vld [vmem:[#allocation2 + $0x68] sm:$0xff]  ;;  %v58_v14 = vld [vmem:[#allocation2 + $0x70] sm:$0xff]  ;;  %v59_v15 = vld [vmem:[#allocation2 + $0x78] sm:$0xff] }
  0x27   :  { %283 = vmatpush.msra.mxu2 %v81_v50  ;;  %217 = vmatpush.msra.mxu1 %v114_v53  ;;  %v60_v16 = vld [vmem:[#allocation2 + $0x80] sm:$0xff]  ;;  %v61_v17 = vld [vmem:[#allocation2 + $0x88] sm:$0xff]  ;;  %v62_v18 = vld [vmem:[#allocation2 + $0x90] sm:$0xff] }
  0x28   :  { %348 = vmatpush.msra.mxu3 %v113_v51  ;;  %153 = vmatpush.msra.mxu0 %v80_v56  ;;  %v63_v19 = vld [vmem:[#allocation2 + $0x98] sm:$0xff]  ;;  %v64_v20 = vld [vmem:[#allocation2 + $0xa0] sm:$0xff]  ;;  %v65_v21 = vld [vmem:[#allocation2 + $0xa8] sm:$0xff] }
  0x29   :  { %284 = vmatpush.msra.mxu2 %v79_v54  ;;  %218 = vmatpush.msra.mxu1 %v112_v57  ;;  %v66_v22 = vld [vmem:[#allocation2 + $0xb0] sm:$0xff]  ;;  %v67_v23 = vld [vmem:[#allocation2 + $0xb8] sm:$0xff]  ;;  %v68_v24 = vld [vmem:[#allocation2 + $0xc0] sm:$0xff] }
  0x2a   :  { %349 = vmatpush.msra.mxu3 %v111_v55  ;;  %154 = vmatpush.msra.mxu0 %v78_v62  ;;  %v69_v25 = vld [vmem:[#allocation2 + $0xc8] sm:$0xff]  ;;  %v70_v26 = vld [vmem:[#allocation2 + $0xd0] sm:$0xff]  ;;  %v71_v27 = vld [vmem:[#allocation2 + $0xd8] sm:$0xff] }
  0x2b   :  { %285 = vmatpush.msra.mxu2 %v77_v58  ;;  %219 = vmatpush.msra.mxu1 %v110_v63  ;;  %v72_v28 = vld [vmem:[#allocation2 + $0xe0] sm:$0xff]  ;;  %v73_v29 = vld [vmem:[#allocation2 + $0xe8] sm:$0xff]  ;;  %v74_v30 = vld [vmem:[#allocation2 + $0xf0] sm:$0xff] }
  0x2c   :  { %350 = vmatpush.msra.mxu3 %v109_v59  ;;  %286 = vmatmul.f32.vlgmr.msra.gmra.mxu2 %v44_v60  ;;  %v75_v31 = vld [vmem:[#allocation2 + $0xf8] sm:$0xff] }
  0x2d   :  { %351 = vmatmul.f32.vlgmr.msra.gmra.mxu3 %v45_v61  ;;  %155 = vmatpush.msra.mxu0 %v76_v0 }
  0x2e   :  { %220 = vmatpush.msra.mxu1 %v108_v1  ;;  %156 = vmatmul.f32.vlgmr.msra.gmra.mxu0 %v44_v60 }
  0x2f   :  { %221 = vmatmul.f32.vlgmr.msra.gmra.mxu1 %v45_v61 }
  0x34   :  { %289 = vmatmul.f32.gmra.mxu2 %v46_v2 }
  0x35   :  { %354 = vmatmul.f32.gmra.mxu3 %v47_v3 }
  0x36   :  { %159 = vmatmul.f32.gmra.mxu0 %v46_v2 }
  0x37   :  { %224 = vmatmul.f32.gmra.mxu1 %v47_v3 }
  0x3c   :  { %292 = vmatmul.f32.gmra.mxu2 %v48_v4 }
  0x3d   :  { %357 = vmatmul.f32.gmra.mxu3 %v49_v5 }
  0x3e   :  { %162 = vmatmul.f32.gmra.mxu0 %v48_v4 }
  0x3f   :  { %227 = vmatmul.f32.gmra.mxu1 %v49_v5 }
  0x44   :  { %295 = vmatmul.f32.gmra.mxu2 %v50_v6 }
  0x45   :  { %360 = vmatmul.f32.gmra.mxu3 %v51_v7 }
  0x46   :  { %165 = vmatmul.f32.gmra.mxu0 %v50_v6 }
  0x47   :  { %230 = vmatmul.f32.gmra.mxu1 %v51_v7 }
  0x4c   :  { %298 = vmatmul.f32.gmra.mxu2 %v52_v8 }
  0x4d   :  { %363 = vmatmul.f32.gmra.mxu3 %v53_v9 }
  0x4e   :  { %168 = vmatmul.f32.gmra.mxu0 %v52_v8 }
  0x4f   :  { %233 = vmatmul.f32.gmra.mxu1 %v53_v9 }
  0x54   :  { %301 = vmatmul.f32.gmra.mxu2 %v54_v10 }
  0x55   :  { %366 = vmatmul.f32.gmra.mxu3 %v55_v11 }
  0x56   :  { %171 = vmatmul.f32.gmra.mxu0 %v54_v10 }
  0x57   :  { %236 = vmatmul.f32.gmra.mxu1 %v55_v11 }
  0x5c   :  { %304 = vmatmul.f32.gmra.mxu2 %v56_v12 }
  0x5d   :  { %369 = vmatmul.f32.gmra.mxu3 %v57_v13 }
  0x5e   :  { %174 = vmatmul.f32.gmra.mxu0 %v56_v12 }
  0x5f   :  { %239 = vmatmul.f32.gmra.mxu1 %v57_v13 }
  0x64   :  { %307 = vmatmul.f32.gmra.mxu2 %v58_v14 }
  0x65   :  { %372 = vmatmul.f32.gmra.mxu3 %v59_v15 }
  0x66   :  { %177 = vmatmul.f32.gmra.mxu0 %v58_v14 }
  0x67   :  { %242 = vmatmul.f32.gmra.mxu1 %v59_v15 }
  0x6c   :  { %310 = vmatmul.f32.gmra.mxu2 %v60_v16 }
  0x6d   :  { %375 = vmatmul.f32.gmra.mxu3 %v61_v17 }
  0x6e   :  { %180 = vmatmul.f32.gmra.mxu0 %v60_v16 }
  0x6f   :  { %245 = vmatmul.f32.gmra.mxu1 %v61_v17 }
  0x74   :  { %313 = vmatmul.f32.gmra.mxu2 %v62_v18 }
  0x75   :  { %378 = vmatmul.f32.gmra.mxu3 %v63_v19 }
  0x76   :  { %183 = vmatmul.f32.gmra.mxu0 %v62_v18 }
  0x77   :  { %248 = vmatmul.f32.gmra.mxu1 %v63_v19 }
  0x7c   :  { %316 = vmatmul.f32.gmra.mxu2 %v64_v20 }
  0x7d   :  { %381 = vmatmul.f32.gmra.mxu3 %v65_v21 }
  0x7e   :  { %186 = vmatmul.f32.gmra.mxu0 %v64_v20 }
  0x7f   :  { %251 = vmatmul.f32.gmra.mxu1 %v65_v21 }
  0x84   :  { %319 = vmatmul.f32.gmra.mxu2 %v66_v22 }
  0x85   :  { %384 = vmatmul.f32.gmra.mxu3 %v67_v23 }
  0x86   :  { %189 = vmatmul.f32.gmra.mxu0 %v66_v22 }
  0x87   :  { %254 = vmatmul.f32.gmra.mxu1 %v67_v23 }
  0x8c   :  { %322 = vmatmul.f32.gmra.mxu2 %v68_v24 }
  0x8d   :  { %387 = vmatmul.f32.gmra.mxu3 %v69_v25 }
  0x8e   :  { %192 = vmatmul.f32.gmra.mxu0 %v68_v24 }
  0x8f   :  { %257 = vmatmul.f32.gmra.mxu1 %v69_v25 }
  0x94   :  { %325 = vmatmul.f32.gmra.mxu2 %v70_v26 }
  0x95   :  { %390 = vmatmul.f32.gmra.mxu3 %v71_v27 }
  0x96   :  { %195 = vmatmul.f32.gmra.mxu0 %v70_v26 }
  0x97   :  { %260 = vmatmul.f32.gmra.mxu1 %v71_v27 }
  0x9c   :  { %328 = vmatmul.f32.gmra.mxu2 %v72_v28 }
  0x9d   :  { %393 = vmatmul.f32.gmra.mxu3 %v73_v29 }
  0x9e   :  { %198 = vmatmul.f32.gmra.mxu0 %v72_v28 }
  0x9f   :  { %263 = vmatmul.f32.gmra.mxu1 %v73_v29 }
  0xa4   :  { %331 = vmatmul.f32.gmra.mxu2 %v74_v30 }
  0xa5   :  { %396 = vmatmul.f32.gmra.mxu3 %v75_v31 }
  0xa6   :  { %201 = vmatmul.f32.gmra.mxu0 %v74_v30 }
  0xa7   :  { %266 = vmatmul.f32.gmra.mxu1 %v75_v31 }
  0xab   :  { %v157_v32 = vpop.f32.mrf.mxu0 }
  0xac   :  { %v222_v33 = vpop.f32.mrf.mxu1 }
  0xad   :  { %v223_v34 = vadd.f32 %v222_v33, %v157_v32 }
  0xaf   :  { %v287_v35 = vpop.f32.mrf.mxu2  ;;  %400 = vst [vmem:[#allocation7] sm:$0xff] %v223_v34 }
  0xb0   :  { %v352_v36 = vpop.f32.mrf.mxu3 }
  0xb1   :  { %v353_v37 = vadd.f32 %v352_v36, %v287_v35 }
  0xb3   :  { %401 = vst [vmem:[#allocation7 + $0x8] sm:$0xff] %v353_v37  ;;  %v160_v38 = vpop.f32.mrf.mxu0 }
  0xb4   :  { %v225_v39 = vpop.f32.mrf.mxu1 }
  0xb5   :  { %v226_v40 = vadd.f32 %v225_v39, %v160_v38 }
  0xb7   :  { %v290_v41 = vpop.f32.mrf.mxu2  ;;  %402 = vst [vmem:[#allocation7 + $0x10] sm:$0xff] %v226_v40 }
  0xb8   :  { %v355_v42 = vpop.f32.mrf.mxu3 }
  0xb9   :  { %v356_v43 = vadd.f32 %v355_v42, %v290_v41 }
  0xbb   :  { %403 = vst [vmem:[#allocation7 + $0x18] sm:$0xff] %v356_v43  ;;  %v163_v44 = vpop.f32.mrf.mxu0 }
  0xbc   :  { %v228_v45 = vpop.f32.mrf.mxu1 }
  0xbd   :  { %v229_v46 = vadd.f32 %v228_v45, %v163_v44 }
  0xbf   :  { %v293_v47 = vpop.f32.mrf.mxu2  ;;  %404 = vst [vmem:[#allocation7 + $0x20] sm:$0xff] %v229_v46 }
  0xc0   :  { %v358_v48 = vpop.f32.mrf.mxu3 }
  0xc1   :  { %v359_v49 = vadd.f32 %v358_v48, %v293_v47 }
  0xc3   :  { %405 = vst [vmem:[#allocation7 + $0x28] sm:$0xff] %v359_v49  ;;  %v166_v50 = vpop.f32.mrf.mxu0 }
  0xc4   :  { %v231_v51 = vpop.f32.mrf.mxu1 }
  0xc5   :  { %v232_v52 = vadd.f32 %v231_v51, %v166_v50 }
  0xc7   :  { %v296_v53 = vpop.f32.mrf.mxu2  ;;  %406 = vst [vmem:[#allocation7 + $0x30] sm:$0xff] %v232_v52 }
  0xc8   :  { %v361_v54 = vpop.f32.mrf.mxu3 }
  0xc9   :  { %v362_v55 = vadd.f32 %v361_v54, %v296_v53 }
  0xcb   :  { %407 = vst [vmem:[#allocation7 + $0x38] sm:$0xff] %v362_v55  ;;  %v169_v56 = vpop.f32.mrf.mxu0 }
  0xcc   :  { %v234_v57 = vpop.f32.mrf.mxu1 }
  0xcd   :  { %v235_v58 = vadd.f32 %v234_v57, %v169_v56 }
  0xcf   :  { %v299_v59 = vpop.f32.mrf.mxu2  ;;  %408 = vst [vmem:[#allocation7 + $0x40] sm:$0xff] %v235_v58 }
  0xd0   :  { %v364_v60 = vpop.f32.mrf.mxu3 }
  0xd1   :  { %v365_v61 = vadd.f32 %v364_v60, %v299_v59 }
  0xd3   :  { %409 = vst [vmem:[#allocation7 + $0x48] sm:$0xff] %v365_v61  ;;  %v172_v62 = vpop.f32.mrf.mxu0 }
  0xd4   :  { %v237_v63 = vpop.f32.mrf.mxu1 }
  0xd5   :  { %v238_v0 = vadd.f32 %v237_v63, %v172_v62 }
  0xd7   :  { %v302_v1 = vpop.f32.mrf.mxu2  ;;  %410 = vst [vmem:[#allocation7 + $0x50] sm:$0xff] %v238_v0 }
  0xd8   :  { %v367_v2 = vpop.f32.mrf.mxu3 }
  0xd9   :  { %v368_v3 = vadd.f32 %v367_v2, %v302_v1 }
  0xdb   :  { %411 = vst [vmem:[#allocation7 + $0x58] sm:$0xff] %v368_v3  ;;  %v175_v4 = vpop.f32.mrf.mxu0 }
  0xdc   :  { %v240_v5 = vpop.f32.mrf.mxu1 }
  0xdd   :  { %v241_v6 = vadd.f32 %v240_v5, %v175_v4 }
  0xdf   :  { %v305_v7 = vpop.f32.mrf.mxu2  ;;  %412 = vst [vmem:[#allocation7 + $0x60] sm:$0xff] %v241_v6 }
  0xe0   :  { %v370_v8 = vpop.f32.mrf.mxu3 }
  0xe1   :  { %v371_v9 = vadd.f32 %v370_v8, %v305_v7 }
  0xe3   :  { %413 = vst [vmem:[#allocation7 + $0x68] sm:$0xff] %v371_v9  ;;  %v178_v10 = vpop.f32.mrf.mxu0 }
  0xe4   :  { %v243_v11 = vpop.f32.mrf.mxu1 }
  0xe5   :  { %v244_v12 = vadd.f32 %v243_v11, %v178_v10 }
  0xe7   :  { %v308_v13 = vpop.f32.mrf.mxu2  ;;  %414 = vst [vmem:[#allocation7 + $0x70] sm:$0xff] %v244_v12 }
  0xe8   :  { %v373_v14 = vpop.f32.mrf.mxu3 }
  0xe9   :  { %v374_v15 = vadd.f32 %v373_v14, %v308_v13 }
  0xeb   :  { %415 = vst [vmem:[#allocation7 + $0x78] sm:$0xff] %v374_v15  ;;  %v181_v16 = vpop.f32.mrf.mxu0 }
  0xec   :  { %v246_v17 = vpop.f32.mrf.mxu1 }
  0xed   :  { %v247_v18 = vadd.f32 %v246_v17, %v181_v16 }
  0xef   :  { %v311_v19 = vpop.f32.mrf.mxu2  ;;  %416 = vst [vmem:[#allocation7 + $0x80] sm:$0xff] %v247_v18 }
  0xf0   :  { %v376_v20 = vpop.f32.mrf.mxu3 }
  0xf1   :  { %v377_v21 = vadd.f32 %v376_v20, %v311_v19 }
  0xf3   :  { %417 = vst [vmem:[#allocation7 + $0x88] sm:$0xff] %v377_v21  ;;  %v184_v22 = vpop.f32.mrf.mxu0 }
  0xf4   :  { %v249_v23 = vpop.f32.mrf.mxu1 }
  0xf5   :  { %v250_v24 = vadd.f32 %v249_v23, %v184_v22 }
  0xf7   :  { %v314_v25 = vpop.f32.mrf.mxu2  ;;  %418 = vst [vmem:[#allocation7 + $0x90] sm:$0xff] %v250_v24 }
  0xf8   :  { %v379_v26 = vpop.f32.mrf.mxu3 }
  0xf9   :  { %v380_v27 = vadd.f32 %v379_v26, %v314_v25 }
  0xfb   :  { %419 = vst [vmem:[#allocation7 + $0x98] sm:$0xff] %v380_v27  ;;  %v187_v28 = vpop.f32.mrf.mxu0 }
  0xfc   :  { %v252_v29 = vpop.f32.mrf.mxu1 }
  0xfd   :  { %v253_v30 = vadd.f32 %v252_v29, %v187_v28 }
  0xff   :  { %v317_v31 = vpop.f32.mrf.mxu2  ;;  %420 = vst [vmem:[#allocation7 + $0xa0] sm:$0xff] %v253_v30 }
 0x100   :  { %v382_v32 = vpop.f32.mrf.mxu3 }
 0x101   :  { %v383_v33 = vadd.f32 %v382_v32, %v317_v31 }
 0x103   :  { %421 = vst [vmem:[#allocation7 + $0xa8] sm:$0xff] %v383_v33  ;;  %v190_v34 = vpop.f32.mrf.mxu0 }
 0x104   :  { %v255_v35 = vpop.f32.mrf.mxu1 }
 0x105   :  { %v256_v36 = vadd.f32 %v255_v35, %v190_v34 }
 0x107   :  { %v320_v37 = vpop.f32.mrf.mxu2  ;;  %422 = vst [vmem:[#allocation7 + $0xb0] sm:$0xff] %v256_v36 }
 0x108   :  { %v385_v38 = vpop.f32.mrf.mxu3 }
 0x109   :  { %v386_v39 = vadd.f32 %v385_v38, %v320_v37 }
 0x10b   :  { %423 = vst [vmem:[#allocation7 + $0xb8] sm:$0xff] %v386_v39  ;;  %v193_v40 = vpop.f32.mrf.mxu0 }
 0x10c   :  { %v258_v41 = vpop.f32.mrf.mxu1 }
 0x10d   :  { %v259_v42 = vadd.f32 %v258_v41, %v193_v40 }
 0x10f   :  { %v323_v43 = vpop.f32.mrf.mxu2  ;;  %424 = vst [vmem:[#allocation7 + $0xc0] sm:$0xff] %v259_v42 }
 0x110   :  { %v388_v44 = vpop.f32.mrf.mxu3 }
 0x111   :  { %v389_v45 = vadd.f32 %v388_v44, %v323_v43 }
 0x113   :  { %425 = vst [vmem:[#allocation7 + $0xc8] sm:$0xff] %v389_v45  ;;  %v196_v46 = vpop.f32.mrf.mxu0 }
 0x114   :  { %v261_v47 = vpop.f32.mrf.mxu1 }
 0x115   :  { %v262_v48 = vadd.f32 %v261_v47, %v196_v46 }
 0x117   :  { %v326_v49 = vpop.f32.mrf.mxu2  ;;  %426 = vst [vmem:[#allocation7 + $0xd0] sm:$0xff] %v262_v48 }
 0x118   :  { %v391_v50 = vpop.f32.mrf.mxu3 }
 0x119   :  { %v392_v51 = vadd.f32 %v391_v50, %v326_v49 }
 0x11b   :  { %427 = vst [vmem:[#allocation7 + $0xd8] sm:$0xff] %v392_v51  ;;  %v199_v52 = vpop.f32.mrf.mxu0 }
 0x11c   :  { %v264_v53 = vpop.f32.mrf.mxu1 }
 0x11d   :  { %v265_v54 = vadd.f32 %v264_v53, %v199_v52 }
 0x11f   :  { %v329_v55 = vpop.f32.mrf.mxu2  ;;  %428 = vst [vmem:[#allocation7 + $0xe0] sm:$0xff] %v265_v54 }
 0x120   :  { %v394_v56 = vpop.f32.mrf.mxu3 }
 0x121   :  { %v395_v57 = vadd.f32 %v394_v56, %v329_v55 }
 0x123   :  { %429 = vst [vmem:[#allocation7 + $0xe8] sm:$0xff] %v395_v57  ;;  %v202_v58 = vpop.f32.mrf.mxu0 }
 0x124   :  { %v267_v59 = vpop.f32.mrf.mxu1 }
 0x125   :  { %v268_v60 = vadd.f32 %v267_v59, %v202_v58 }
 0x127   :  { %v332_v61 = vpop.f32.mrf.mxu2  ;;  %430 = vst [vmem:[#allocation7 + $0xf0] sm:$0xff] %v268_v60 }
 0x128   :  { %v397_v62 = vpop.f32.mrf.mxu3 }
 0x129   :  { %v398_v63 = vadd.f32 %v397_v62, %v332_v61 }
 0x12b   :  { %431 = vst [vmem:[#allocation7 + $0xf8] sm:$0xff] %v398_v63 }
 0x12c   :  { %444 = dma.vmem_to_hbm [thread:$0]  %s437_s1, 4096, %s439_s23, [#allocation4], %s536_s17, %s536_s17, %s537_s18  }
 0x12d   :  { %533 = dma.done.wait [#allocation4], 4096  }
 0x12e   :  { %534 = vsyncadd [#allocation4], 4294963200 }
 0x12f   :  { %449 = vsyncpa [#allocation3], 1 }
 0x130   :  { %450 = vsyncpa [#allocation6], 1 }
 0x131   :  { %451 = vsyncpa [#allocation4], 1 }

</bundles_post_ra>
